<compile_context>
chip_gen: v7x
topology: tpu7x:2x2x1
jax: 0.10.0
libtpu: 0.0.40
codegen_flags: <defaults>
</compile_context>

<pallas_src>
import functools

import jax
import jax.numpy as jnp
from jax.experimental import pallas as pl
from jax.experimental.pallas import tpu as pltpu

_LANE = 128


def _round_up(x, m):
    return ((x + m - 1) // m) * m


def _mvsdpa_kernel(qt_ref, kt_ref, vt_ref, outt_ref, attnt_ref, *, inv_temperature):
    # qt: (DK, TB), kt: (DK, L, TB), vt: (L, DV, TB) — batch TB sits on lanes.
    dk, tb = qt_ref.shape
    l = kt_ref.shape[1]
    dv = vt_ref.shape[1]

    # ---- QK: logits[l, b] = sum_d q[d, b] * k[d, l, b] ----
    # Leading-axis accumulation: each step is a sublane broadcast + VPU mul/add on an
    # (L, TB) slab. No (DK, L, TB) temporary, no cross-lane (XLU) reduce.
    logits = jnp.zeros((l, tb), jnp.float32)
    for d in range(dk):
        qd = qt_ref[pl.ds(d, 1), :].astype(jnp.float32)   # (1, TB)
        kd = kt_ref[d].astype(jnp.float32)                # (L, TB)
        logits = logits + qd * kd
    logits = logits * inv_temperature

    # ---- softmax over L (tiny sublane-axis reduce, L rows) ----
    m = jnp.max(logits, axis=0, keepdims=True)            # (1, TB)
    e = jnp.exp(logits - m)                               # (L, TB)
    denom = jnp.sum(e, axis=0, keepdims=True)             # (1, TB)
    r = pl.reciprocal(denom, approx=True)                 # EUP seed (off the VALU path)
    r = r * (2.0 - denom * r)                             # one Newton step -> ~f32 accuracy
    p = e * r                                             # (L, TB)
    # TODO(synk): training-mode dropout on p (identity / eval-mode here).

    # ---- PV: out[d, b] = sum_l p[l, b] * v[l, d, b] ----
    # Keep probabilities in v's dtype when v is bf16 (halves VALU width on v6e/v7x).
    p_w = p.astype(vt_ref.dtype) if vt_ref.dtype == jnp.bfloat16 else p
    out = jnp.zeros((dv, tb), jnp.float32)
    for li in range(l):
        out = out + (p_w[li:li + 1, :] * vt_ref[li]).astype(jnp.float32)

    outt_ref[...] = out.astype(outt_ref.dtype)
    attnt_ref[...] = p.astype(attnt_ref.dtype)


def mv_scaled_dot_product_attention(q, k, v, temperature, *, block_nb=1024):
    """q: (NB, DK), k: (NB, L, DK), v: (NB, L, DV) -> ((NB, DV), (NB, L))."""
    nb, dk = q.shape
    nb_k, l, dk2 = k.shape
    nb_v, l2, dv = v.shape
    assert dk == dk2 and nb_k == nb and nb_v == nb and l2 == l

    out_dtype = q.dtype

    # --- pick a lane-dense batch tile, clamped to a double-buffered VMEM budget ---
    itemsize = jnp.dtype(q.dtype).itemsize
    bytes_per_row = (dk + l * dk + l * dv + dv + l) * itemsize
    vmem_budget = 16 * 1024 * 1024  # 2x-buffered blocks stay well inside scoped VMEM on all gens
    max_rows = max(_LANE, ((vmem_budget // (2 * bytes_per_row)) // _LANE) * _LANE)
    nb_lanes = _round_up(nb, _LANE)
    block_nb = max(_LANE, min(_round_up(block_nb, _LANE), max_rows, nb_lanes))
    nb_pad = _round_up(nb_lanes, block_nb)

    pad = nb_pad - nb
    if pad:
        q = jnp.pad(q, ((0, pad), (0, 0)))
        k = jnp.pad(k, ((0, pad), (0, 0), (0, 0)))
        v = jnp.pad(v, ((0, pad), (0, 0), (0, 0)))

    # --- batch-on-lanes layout (layout plumbing outside the kernel) ---
    qt = q.T                            # (DK, NBp)
    kt = jnp.transpose(k, (2, 1, 0))    # (DK, L, NBp)
    vt = jnp.transpose(v, (1, 2, 0))    # (L, DV, NBp)

    grid = (nb_pad // block_nb,)
    kernel = functools.partial(_mvsdpa_kernel, inv_temperature=1.0 / float(temperature))

    outt, attnt = pl.pallas_call(
        kernel,
        out_shape=(
            jax.ShapeDtypeStruct((dv, nb_pad), out_dtype),
            jax.ShapeDtypeStruct((l, nb_pad), out_dtype),
        ),
        grid_spec=pltpu.PrefetchScalarGridSpec(
            num_scalar_prefetch=0,
            grid=grid,
            in_specs=[
                pl.BlockSpec((dk, block_nb), lambda i: (0, i)),
                pl.BlockSpec((dk, l, block_nb), lambda i: (0, 0, i)),
                pl.BlockSpec((l, dv, block_nb), lambda i: (0, 0, i)),
            ],
            out_specs=[
                pl.BlockSpec((dv, block_nb), lambda i: (0, i)),
                pl.BlockSpec((l, block_nb), lambda i: (0, i)),
            ],
        ),
        compiler_params=pltpu.CompilerParams(
            dimension_semantics=("parallel",),
            vmem_limit_bytes=32 * 1024 * 1024,
        ),
    )(qt, kt, vt)

    out = outt.T[:nb]
    attn = attnt.T[:nb]
    return out, attn


def _reference(q, k, v, temperature):
    attn = jnp.sum(q[:, None, :] * k, axis=2) / temperature
    attn = jax.nn.softmax(attn, axis=1)
    out = jnp.sum(attn[:, :, None] * v, axis=1)
    return out, attn


if __name__ == "__main__":
    key = jax.random.PRNGKey(0)
    kq, kk, kv = jax.random.split(key, 3)

    # small shapes consistent with the module: (n*b, d_k), (n*b, l, d_k), (n*b, l, d_v)
    NB, L, DK, DV = 16, 8, 32, 32
    temperature = float(DK) ** 0.5

    q = jax.random.normal(kq, (NB, DK), dtype=jnp.float32)
    k = jax.random.normal(kk, (NB, L, DK), dtype=jnp.float32)
    v = jax.random.normal(kv, (NB, L, DV), dtype=jnp.float32)

    out, attn = mv_scaled_dot_product_attention(q, k, v, temperature)
    jax.block_until_ready((out, attn))

    ref_out, ref_attn = _reference(q, k, v, temperature)
    assert out.shape == (NB, DV) and attn.shape == (NB, L)
    assert jnp.allclose(out, ref_out, atol=1e-4, rtol=1e-4)
    assert jnp.allclose(attn, ref_attn, atol=1e-4, rtol=1e-4)

    # second check: batch not a multiple of the lane/block size, multi-block grid
    NB2 = 300
    kq2, kk2, kv2 = jax.random.split(jax.random.PRNGKey(1), 3)
    q2 = jax.random.normal(kq2, (NB2, DK), dtype=jnp.float32)
    k2 = jax.random.normal(kk2, (NB2, L, DK), dtype=jnp.float32)
    v2 = jax.random.normal(kv2, (NB2, L, DV), dtype=jnp.float32)
    out2, attn2 = mv_scaled_dot_product_attention(q2, k2, v2, temperature, block_nb=128)
    jax.block_until_ready((out2, attn2))
    ref_out2, ref_attn2 = _reference(q2, k2, v2, temperature)
    assert out2.shape == (NB2, DV) and attn2.shape == (NB2, L)
    assert jnp.allclose(out2, ref_out2, atol=1e-4, rtol=1e-4)
    assert jnp.allclose(attn2, ref_attn2, atol=1e-4, rtol=1e-4)

    print("KERNEL_OK")
</pallas_src>

<mosaic_0001>
module attributes {stable_mosaic.version = 11 : i64} {
  func.func @_mvsdpa_kernel(%arg0: i32, %arg1: memref<32x128xf32, #tpu.memory_space<vmem>>, %arg2: memref<32x8x128xf32, #tpu.memory_space<vmem>>, %arg3: memref<8x32x128xf32, #tpu.memory_space<vmem>>, %arg4: memref<32x128xf32, #tpu.memory_space<vmem>>, %arg5: memref<8x128xf32, #tpu.memory_space<vmem>>) attributes {dimension_semantics = [#tpu.dimension_semantics<parallel>], iteration_bounds = array<i64: 1>, scalar_prefetch = 0 : i64, scratch_operands = 0 : i64, tpu.core_type = #tpu.core_type<tc>, window_params = [{transform_indices = @transform_0, window_bounds = array<i64: 32, 128>}, {transform_indices = @transform_1, window_bounds = array<i64: 32, 8, 128>}, {transform_indices = @transform_2, window_bounds = array<i64: 8, 32, 128>}, {transform_indices = @transform_3, window_bounds = array<i64: 32, 128>}, {transform_indices = @transform_4, window_bounds = array<i64: 8, 128>}]} {
    %cst = arith.constant 0.000000e+00 : f32
    %0 = vector.broadcast %cst : f32 to vector<8x128xf32>
    %c0 = arith.constant 0 : index
    %c0_0 = arith.constant 0 : index
    %1 = vector.load %arg1[%c0, %c0_0] : memref<32x128xf32, #tpu.memory_space<vmem>>, vector<1x128xf32>
    %c0_1 = arith.constant 0 : index
    %c0_2 = arith.constant 0 : index
    %c0_3 = arith.constant 0 : index
    %2 = vector.load %arg2[%c0_1, %c0_2, %c0_3] : memref<32x8x128xf32, #tpu.memory_space<vmem>>, vector<1x8x128xf32>
    %3 = vector.shape_cast %2 : vector<1x8x128xf32> to vector<8x128xf32>
    %4 = vector.broadcast %1 : vector<1x128xf32> to vector<8x128xf32>
    %5 = arith.mulf %4, %3 : vector<8x128xf32>
    %6 = arith.addf %0, %5 : vector<8x128xf32>
    %c1 = arith.constant 1 : index
    %c0_4 = arith.constant 0 : index
    %7 = vector.load %arg1[%c1, %c0_4] : memref<32x128xf32, #tpu.memory_space<vmem>>, vector<1x128xf32>
    %c1_5 = arith.constant 1 : index
    %c0_6 = arith.constant 0 : index
    %c0_7 = arith.constant 0 : index
    %8 = vector.load %arg2[%c1_5, %c0_6, %c0_7] : memref<32x8x128xf32, #tpu.memory_space<vmem>>, vector<1x8x128xf32>
    %9 = vector.shape_cast %8 : vector<1x8x128xf32> to vector<8x128xf32>
    %10 = vector.broadcast %7 : vector<1x128xf32> to vector<8x128xf32>
    %11 = arith.mulf %10, %9 : vector<8x128xf32>
    %12 = arith.addf %6, %11 : vector<8x128xf32>
    %c2 = arith.constant 2 : index
    %c0_8 = arith.constant 0 : index
    %13 = vector.load %arg1[%c2, %c0_8] : memref<32x128xf32, #tpu.memory_space<vmem>>, vector<1x128xf32>
    %c2_9 = arith.constant 2 : index
    %c0_10 = arith.constant 0 : index
    %c0_11 = arith.constant 0 : index
    %14 = vector.load %arg2[%c2_9, %c0_10, %c0_11] : memref<32x8x128xf32, #tpu.memory_space<vmem>>, vector<1x8x128xf32>
    %15 = vector.shape_cast %14 : vector<1x8x128xf32> to vector<8x128xf32>
    %16 = vector.broadcast %13 : vector<1x128xf32> to vector<8x128xf32>
    %17 = arith.mulf %16, %15 : vector<8x128xf32>
    %18 = arith.addf %12, %17 : vector<8x128xf32>
    %c3 = arith.constant 3 : index
    %c0_12 = arith.constant 0 : index
    %19 = vector.load %arg1[%c3, %c0_12] : memref<32x128xf32, #tpu.memory_space<vmem>>, vector<1x128xf32>
    %c3_13 = arith.constant 3 : index
    %c0_14 = arith.constant 0 : index
    %c0_15 = arith.constant 0 : index
    %20 = vector.load %arg2[%c3_13, %c0_14, %c0_15] : memref<32x8x128xf32, #tpu.memory_space<vmem>>, vector<1x8x128xf32>
    %21 = vector.shape_cast %20 : vector<1x8x128xf32> to vector<8x128xf32>
    %22 = vector.broadcast %19 : vector<1x128xf32> to vector<8x128xf32>
    %23 = arith.mulf %22, %21 : vector<8x128xf32>
    %24 = arith.addf %18, %23 : vector<8x128xf32>
    %c4 = arith.constant 4 : index
    %c0_16 = arith.constant 0 : index
    %25 = vector.load %arg1[%c4, %c0_16] : memref<32x128xf32, #tpu.memory_space<vmem>>, vector<1x128xf32>
    %c4_17 = arith.constant 4 : index
    %c0_18 = arith.constant 0 : index
    %c0_19 = arith.constant 0 : index
    %26 = vector.load %arg2[%c4_17, %c0_18, %c0_19] : memref<32x8x128xf32, #tpu.memory_space<vmem>>, vector<1x8x128xf32>
    %27 = vector.shape_cast %26 : vector<1x8x128xf32> to vector<8x128xf32>
    %28 = vector.broadcast %25 : vector<1x128xf32> to vector<8x128xf32>
    %29 = arith.mulf %28, %27 : vector<8x128xf32>
    %30 = arith.addf %24, %29 : vector<8x128xf32>
    %c5 = arith.constant 5 : index
    %c0_20 = arith.constant 0 : index
    %31 = vector.load %arg1[%c5, %c0_20] : memref<32x128xf32, #tpu.memory_space<vmem>>, vector<1x128xf32>
    %c5_21 = arith.constant 5 : index
    %c0_22 = arith.constant 0 : index
    %c0_23 = arith.constant 0 : index
    %32 = vector.load %arg2[%c5_21, %c0_22, %c0_23] : memref<32x8x128xf32, #tpu.memory_space<vmem>>, vector<1x8x128xf32>
    %33 = vector.shape_cast %32 : vector<1x8x128xf32> to vector<8x128xf32>
    %34 = vector.broadcast %31 : vector<1x128xf32> to vector<8x128xf32>
    %35 = arith.mulf %34, %33 : vector<8x128xf32>
    %36 = arith.addf %30, %35 : vector<8x128xf32>
    %c6 = arith.constant 6 : index
    %c0_24 = arith.constant 0 : index
    %37 = vector.load %arg1[%c6, %c0_24] : memref<32x128xf32, #tpu.memory_space<vmem>>, vector<1x128xf32>
    %c6_25 = arith.constant 6 : index
    %c0_26 = arith.constant 0 : index
    %c0_27 = arith.constant 0 : index
    %38 = vector.load %arg2[%c6_25, %c0_26, %c0_27] : memref<32x8x128xf32, #tpu.memory_space<vmem>>, vector<1x8x128xf32>
    %39 = vector.shape_cast %38 : vector<1x8x128xf32> to vector<8x128xf32>
    %40 = vector.broadcast %37 : vector<1x128xf32> to vector<8x128xf32>
    %41 = arith.mulf %40, %39 : vector<8x128xf32>
    %42 = arith.addf %36, %41 : vector<8x128xf32>
    %c7 = arith.constant 7 : index
    %c0_28 = arith.constant 0 : index
    %43 = vector.load %arg1[%c7, %c0_28] : memref<32x128xf32, #tpu.memory_space<vmem>>, vector<1x128xf32>
    %c7_29 = arith.constant 7 : index
    %c0_30 = arith.constant 0 : index
    %c0_31 = arith.constant 0 : index
    %44 = vector.load %arg2[%c7_29, %c0_30, %c0_31] : memref<32x8x128xf32, #tpu.memory_space<vmem>>, vector<1x8x128xf32>
    %45 = vector.shape_cast %44 : vector<1x8x128xf32> to vector<8x128xf32>
    %46 = vector.broadcast %43 : vector<1x128xf32> to vector<8x128xf32>
    %47 = arith.mulf %46, %45 : vector<8x128xf32>
    %48 = arith.addf %42, %47 : vector<8x128xf32>
    %c8 = arith.constant 8 : index
    %c0_32 = arith.constant 0 : index
    %49 = vector.load %arg1[%c8, %c0_32] : memref<32x128xf32, #tpu.memory_space<vmem>>, vector<1x128xf32>
    %c8_33 = arith.constant 8 : index
    %c0_34 = arith.constant 0 : index
    %c0_35 = arith.constant 0 : index
    %50 = vector.load %arg2[%c8_33, %c0_34, %c0_35] : memref<32x8x128xf32, #tpu.memory_space<vmem>>, vector<1x8x128xf32>
    %51 = vector.shape_cast %50 : vector<1x8x128xf32> to vector<8x128xf32>
    %52 = vector.broadcast %49 : vector<1x128xf32> to vector<8x128xf32>
    %53 = arith.mulf %52, %51 : vector<8x128xf32>
    %54 = arith.addf %48, %53 : vector<8x128xf32>
    %c9 = arith.constant 9 : index
    %c0_36 = arith.constant 0 : index
    %55 = vector.load %arg1[%c9, %c0_36] : memref<32x128xf32, #tpu.memory_space<vmem>>, vector<1x128xf32>
    %c9_37 = arith.constant 9 : index
    %c0_38 = arith.constant 0 : index
    %c0_39 = arith.constant 0 : index
    %56 = vector.load %arg2[%c9_37, %c0_38, %c0_39] : memref<32x8x128xf32, #tpu.memory_space<vmem>>, vector<1x8x128xf32>
    %57 = vector.shape_cast %56 : vector<1x8x128xf32> to vector<8x128xf32>
    %58 = vector.broadcast %55 : vector<1x128xf32> to vector<8x128xf32>
    %59 = arith.mulf %58, %57 : vector<8x128xf32>
    %60 = arith.addf %54, %59 : vector<8x128xf32>
    %c10 = arith.constant 10 : index
    %c0_40 = arith.constant 0 : index
    %61 = vector.load %arg1[%c10, %c0_40] : memref<32x128xf32, #tpu.memory_space<vmem>>, vector<1x128xf32>
    %c10_41 = arith.constant 10 : index
    %c0_42 = arith.constant 0 : index
    %c0_43 = arith.constant 0 : index
    %62 = vector.load %arg2[%c10_41, %c0_42, %c0_43] : memref<32x8x128xf32, #tpu.memory_space<vmem>>, vector<1x8x128xf32>
    %63 = vector.shape_cast %62 : vector<1x8x128xf32> to vector<8x128xf32>
    %64 = vector.broadcast %61 : vector<1x128xf32> to vector<8x128xf32>
    %65 = arith.mulf %64, %63 : vector<8x128xf32>
    %66 = arith.addf %60, %65 : vector<8x128xf32>
    %c11 = arith.constant 11 : index
    %c0_44 = arith.constant 0 : index
    %67 = vector.load %arg1[%c11, %c0_44] : memref<32x128xf32, #tpu.memory_space<vmem>>, vector<1x128xf32>
    %c11_45 = arith.constant 11 : index
    %c0_46 = arith.constant 0 : index
    %c0_47 = arith.constant 0 : index
    %68 = vector.load %arg2[%c11_45, %c0_46, %c0_47] : memref<32x8x128xf32, #tpu.memory_space<vmem>>, vector<1x8x128xf32>
    %69 = vector.shape_cast %68 : vector<1x8x128xf32> to vector<8x128xf32>
    %70 = vector.broadcast %67 : vector<1x128xf32> to vector<8x128xf32>
    %71 = arith.mulf %70, %69 : vector<8x128xf32>
    %72 = arith.addf %66, %71 : vector<8x128xf32>
    %c12 = arith.constant 12 : index
    %c0_48 = arith.constant 0 : index
    %73 = vector.load %arg1[%c12, %c0_48] : memref<32x128xf32, #tpu.memory_space<vmem>>, vector<1x128xf32>
    %c12_49 = arith.constant 12 : index
    %c0_50 = arith.constant 0 : index
    %c0_51 = arith.constant 0 : index
    %74 = vector.load %arg2[%c12_49, %c0_50, %c0_51] : memref<32x8x128xf32, #tpu.memory_space<vmem>>, vector<1x8x128xf32>
    %75 = vector.shape_cast %74 : vector<1x8x128xf32> to vector<8x128xf32>
    %76 = vector.broadcast %73 : vector<1x128xf32> to vector<8x128xf32>
    %77 = arith.mulf %76, %75 : vector<8x128xf32>
    %78 = arith.addf %72, %77 : vector<8x128xf32>
    %c13 = arith.constant 13 : index
    %c0_52 = arith.constant 0 : index
    %79 = vector.load %arg1[%c13, %c0_52] : memref<32x128xf32, #tpu.memory_space<vmem>>, vector<1x128xf32>
    %c13_53 = arith.constant 13 : index
    %c0_54 = arith.constant 0 : index
    %c0_55 = arith.constant 0 : index
    %80 = vector.load %arg2[%c13_53, %c0_54, %c0_55] : memref<32x8x128xf32, #tpu.memory_space<vmem>>, vector<1x8x128xf32>
    %81 = vector.shape_cast %80 : vector<1x8x128xf32> to vector<8x128xf32>
    %82 = vector.broadcast %79 : vector<1x128xf32> to vector<8x128xf32>
    %83 = arith.mulf %82, %81 : vector<8x128xf32>
    %84 = arith.addf %78, %83 : vector<8x128xf32>
    %c14 = arith.constant 14 : index
    %c0_56 = arith.constant 0 : index
    %85 = vector.load %arg1[%c14, %c0_56] : memref<32x128xf32, #tpu.memory_space<vmem>>, vector<1x128xf32>
    %c14_57 = arith.constant 14 : index
    %c0_58 = arith.constant 0 : index
    %c0_59 = arith.constant 0 : index
    %86 = vector.load %arg2[%c14_57, %c0_58, %c0_59] : memref<32x8x128xf32, #tpu.memory_space<vmem>>, vector<1x8x128xf32>
    %87 = vector.shape_cast %86 : vector<1x8x128xf32> to vector<8x128xf32>
    %88 = vector.broadcast %85 : vector<1x128xf32> to vector<8x128xf32>
    %89 = arith.mulf %88, %87 : vector<8x128xf32>
    %90 = arith.addf %84, %89 : vector<8x128xf32>
    %c15 = arith.constant 15 : index
    %c0_60 = arith.constant 0 : index
    %91 = vector.load %arg1[%c15, %c0_60] : memref<32x128xf32, #tpu.memory_space<vmem>>, vector<1x128xf32>
    %c15_61 = arith.constant 15 : index
    %c0_62 = arith.constant 0 : index
    %c0_63 = arith.constant 0 : index
    %92 = vector.load %arg2[%c15_61, %c0_62, %c0_63] : memref<32x8x128xf32, #tpu.memory_space<vmem>>, vector<1x8x128xf32>
    %93 = vector.shape_cast %92 : vector<1x8x128xf32> to vector<8x128xf32>
    %94 = vector.broadcast %91 : vector<1x128xf32> to vector<8x128xf32>
    %95 = arith.mulf %94, %93 : vector<8x128xf32>
    %96 = arith.addf %90, %95 : vector<8x128xf32>
    %c16 = arith.constant 16 : index
    %c0_64 = arith.constant 0 : index
    %97 = vector.load %arg1[%c16, %c0_64] : memref<32x128xf32, #tpu.memory_space<vmem>>, vector<1x128xf32>
    %c16_65 = arith.constant 16 : index
    %c0_66 = arith.constant 0 : index
    %c0_67 = arith.constant 0 : index
    %98 = vector.load %arg2[%c16_65, %c0_66, %c0_67] : memref<32x8x128xf32, #tpu.memory_space<vmem>>, vector<1x8x128xf32>
    %99 = vector.shape_cast %98 : vector<1x8x128xf32> to vector<8x128xf32>
    %100 = vector.broadcast %97 : vector<1x128xf32> to vector<8x128xf32>
    %101 = arith.mulf %100, %99 : vector<8x128xf32>
    %102 = arith.addf %96, %101 : vector<8x128xf32>
    %c17 = arith.constant 17 : index
    %c0_68 = arith.constant 0 : index
    %103 = vector.load %arg1[%c17, %c0_68] : memref<32x128xf32, #tpu.memory_space<vmem>>, vector<1x128xf32>
    %c17_69 = arith.constant 17 : index
    %c0_70 = arith.constant 0 : index
    %c0_71 = arith.constant 0 : index
    %104 = vector.load %arg2[%c17_69, %c0_70, %c0_71] : memref<32x8x128xf32, #tpu.memory_space<vmem>>, vector<1x8x128xf32>
    %105 = vector.shape_cast %104 : vector<1x8x128xf32> to vector<8x128xf32>
    %106 = vector.broadcast %103 : vector<1x128xf32> to vector<8x128xf32>
    %107 = arith.mulf %106, %105 : vector<8x128xf32>
    %108 = arith.addf %102, %107 : vector<8x128xf32>
    %c18 = arith.constant 18 : index
    %c0_72 = arith.constant 0 : index
    %109 = vector.load %arg1[%c18, %c0_72] : memref<32x128xf32, #tpu.memory_space<vmem>>, vector<1x128xf32>
    %c18_73 = arith.constant 18 : index
    %c0_74 = arith.constant 0 : index
    %c0_75 = arith.constant 0 : index
    %110 = vector.load %arg2[%c18_73, %c0_74, %c0_75] : memref<32x8x128xf32, #tpu.memory_space<vmem>>, vector<1x8x128xf32>
    %111 = vector.shape_cast %110 : vector<1x8x128xf32> to vector<8x128xf32>
    %112 = vector.broadcast %109 : vector<1x128xf32> to vector<8x128xf32>
    %113 = arith.mulf %112, %111 : vector<8x128xf32>
    %114 = arith.addf %108, %113 : vector<8x128xf32>
    %c19 = arith.constant 19 : index
    %c0_76 = arith.constant 0 : index
    %115 = vector.load %arg1[%c19, %c0_76] : memref<32x128xf32, #tpu.memory_space<vmem>>, vector<1x128xf32>
    %c19_77 = arith.constant 19 : index
    %c0_78 = arith.constant 0 : index
    %c0_79 = arith.constant 0 : index
    %116 = vector.load %arg2[%c19_77, %c0_78, %c0_79] : memref<32x8x128xf32, #tpu.memory_space<vmem>>, vector<1x8x128xf32>
    %117 = vector.shape_cast %116 : vector<1x8x128xf32> to vector<8x128xf32>
    %118 = vector.broadcast %115 : vector<1x128xf32> to vector<8x128xf32>
    %119 = arith.mulf %118, %117 : vector<8x128xf32>
    %120 = arith.addf %114, %119 : vector<8x128xf32>
    %c20 = arith.constant 20 : index
    %c0_80 = arith.constant 0 : index
    %121 = vector.load %arg1[%c20, %c0_80] : memref<32x128xf32, #tpu.memory_space<vmem>>, vector<1x128xf32>
    %c20_81 = arith.constant 20 : index
    %c0_82 = arith.constant 0 : index
    %c0_83 = arith.constant 0 : index
    %122 = vector.load %arg2[%c20_81, %c0_82, %c0_83] : memref<32x8x128xf32, #tpu.memory_space<vmem>>, vector<1x8x128xf32>
    %123 = vector.shape_cast %122 : vector<1x8x128xf32> to vector<8x128xf32>
    %124 = vector.broadcast %121 : vector<1x128xf32> to vector<8x128xf32>
    %125 = arith.mulf %124, %123 : vector<8x128xf32>
    %126 = arith.addf %120, %125 : vector<8x128xf32>
    %c21 = arith.constant 21 : index
    %c0_84 = arith.constant 0 : index
    %127 = vector.load %arg1[%c21, %c0_84] : memref<32x128xf32, #tpu.memory_space<vmem>>, vector<1x128xf32>
    %c21_85 = arith.constant 21 : index
    %c0_86 = arith.constant 0 : index
    %c0_87 = arith.constant 0 : index
    %128 = vector.load %arg2[%c21_85, %c0_86, %c0_87] : memref<32x8x128xf32, #tpu.memory_space<vmem>>, vector<1x8x128xf32>
    %129 = vector.shape_cast %128 : vector<1x8x128xf32> to vector<8x128xf32>
    %130 = vector.broadcast %127 : vector<1x128xf32> to vector<8x128xf32>
    %131 = arith.mulf %130, %129 : vector<8x128xf32>
    %132 = arith.addf %126, %131 : vector<8x128xf32>
    %c22 = arith.constant 22 : index
    %c0_88 = arith.constant 0 : index
    %133 = vector.load %arg1[%c22, %c0_88] : memref<32x128xf32, #tpu.memory_space<vmem>>, vector<1x128xf32>
    %c22_89 = arith.constant 22 : index
    %c0_90 = arith.constant 0 : index
    %c0_91 = arith.constant 0 : index
    %134 = vector.load %arg2[%c22_89, %c0_90, %c0_91] : memref<32x8x128xf32, #tpu.memory_space<vmem>>, vector<1x8x128xf32>
    %135 = vector.shape_cast %134 : vector<1x8x128xf32> to vector<8x128xf32>
    %136 = vector.broadcast %133 : vector<1x128xf32> to vector<8x128xf32>
    %137 = arith.mulf %136, %135 : vector<8x128xf32>
    %138 = arith.addf %132, %137 : vector<8x128xf32>
    %c23 = arith.constant 23 : index
    %c0_92 = arith.constant 0 : index
    %139 = vector.load %arg1[%c23, %c0_92] : memref<32x128xf32, #tpu.memory_space<vmem>>, vector<1x128xf32>
    %c23_93 = arith.constant 23 : index
    %c0_94 = arith.constant 0 : index
    %c0_95 = arith.constant 0 : index
    %140 = vector.load %arg2[%c23_93, %c0_94, %c0_95] : memref<32x8x128xf32, #tpu.memory_space<vmem>>, vector<1x8x128xf32>
    %141 = vector.shape_cast %140 : vector<1x8x128xf32> to vector<8x128xf32>
    %142 = vector.broadcast %139 : vector<1x128xf32> to vector<8x128xf32>
    %143 = arith.mulf %142, %141 : vector<8x128xf32>
    %144 = arith.addf %138, %143 : vector<8x128xf32>
    %c24 = arith.constant 24 : index
    %c0_96 = arith.constant 0 : index
    %145 = vector.load %arg1[%c24, %c0_96] : memref<32x128xf32, #tpu.memory_space<vmem>>, vector<1x128xf32>
    %c24_97 = arith.constant 24 : index
    %c0_98 = arith.constant 0 : index
    %c0_99 = arith.constant 0 : index
    %146 = vector.load %arg2[%c24_97, %c0_98, %c0_99] : memref<32x8x128xf32, #tpu.memory_space<vmem>>, vector<1x8x128xf32>
    %147 = vector.shape_cast %146 : vector<1x8x128xf32> to vector<8x128xf32>
    %148 = vector.broadcast %145 : vector<1x128xf32> to vector<8x128xf32>
    %149 = arith.mulf %148, %147 : vector<8x128xf32>
    %150 = arith.addf %144, %149 : vector<8x128xf32>
    %c25 = arith.constant 25 : index
    %c0_100 = arith.constant 0 : index
    %151 = vector.load %arg1[%c25, %c0_100] : memref<32x128xf32, #tpu.memory_space<vmem>>, vector<1x128xf32>
    %c25_101 = arith.constant 25 : index
    %c0_102 = arith.constant 0 : index
    %c0_103 = arith.constant 0 : index
    %152 = vector.load %arg2[%c25_101, %c0_102, %c0_103] : memref<32x8x128xf32, #tpu.memory_space<vmem>>, vector<1x8x128xf32>
    %153 = vector.shape_cast %152 : vector<1x8x128xf32> to vector<8x128xf32>
    %154 = vector.broadcast %151 : vector<1x128xf32> to vector<8x128xf32>
    %155 = arith.mulf %154, %153 : vector<8x128xf32>
    %156 = arith.addf %150, %155 : vector<8x128xf32>
    %c26 = arith.constant 26 : index
    %c0_104 = arith.constant 0 : index
    %157 = vector.load %arg1[%c26, %c0_104] : memref<32x128xf32, #tpu.memory_space<vmem>>, vector<1x128xf32>
    %c26_105 = arith.constant 26 : index
    %c0_106 = arith.constant 0 : index
    %c0_107 = arith.constant 0 : index
    %158 = vector.load %arg2[%c26_105, %c0_106, %c0_107] : memref<32x8x128xf32, #tpu.memory_space<vmem>>, vector<1x8x128xf32>
    %159 = vector.shape_cast %158 : vector<1x8x128xf32> to vector<8x128xf32>
    %160 = vector.broadcast %157 : vector<1x128xf32> to vector<8x128xf32>
    %161 = arith.mulf %160, %159 : vector<8x128xf32>
    %162 = arith.addf %156, %161 : vector<8x128xf32>
    %c27 = arith.constant 27 : index
    %c0_108 = arith.constant 0 : index
    %163 = vector.load %arg1[%c27, %c0_108] : memref<32x128xf32, #tpu.memory_space<vmem>>, vector<1x128xf32>
    %c27_109 = arith.constant 27 : index
    %c0_110 = arith.constant 0 : index
    %c0_111 = arith.constant 0 : index
    %164 = vector.load %arg2[%c27_109, %c0_110, %c0_111] : memref<32x8x128xf32, #tpu.memory_space<vmem>>, vector<1x8x128xf32>
    %165 = vector.shape_cast %164 : vector<1x8x128xf32> to vector<8x128xf32>
    %166 = vector.broadcast %163 : vector<1x128xf32> to vector<8x128xf32>
    %167 = arith.mulf %166, %165 : vector<8x128xf32>
    %168 = arith.addf %162, %167 : vector<8x128xf32>
    %c28 = arith.constant 28 : index
    %c0_112 = arith.constant 0 : index
    %169 = vector.load %arg1[%c28, %c0_112] : memref<32x128xf32, #tpu.memory_space<vmem>>, vector<1x128xf32>
    %c28_113 = arith.constant 28 : index
    %c0_114 = arith.constant 0 : index
    %c0_115 = arith.constant 0 : index
    %170 = vector.load %arg2[%c28_113, %c0_114, %c0_115] : memref<32x8x128xf32, #tpu.memory_space<vmem>>, vector<1x8x128xf32>
    %171 = vector.shape_cast %170 : vector<1x8x128xf32> to vector<8x128xf32>
    %172 = vector.broadcast %169 : vector<1x128xf32> to vector<8x128xf32>
    %173 = arith.mulf %172, %171 : vector<8x128xf32>
    %174 = arith.addf %168, %173 : vector<8x128xf32>
    %c29 = arith.constant 29 : index
    %c0_116 = arith.constant 0 : index
    %175 = vector.load %arg1[%c29, %c0_116] : memref<32x128xf32, #tpu.memory_space<vmem>>, vector<1x128xf32>
    %c29_117 = arith.constant 29 : index
    %c0_118 = arith.constant 0 : index
    %c0_119 = arith.constant 0 : index
    %176 = vector.load %arg2[%c29_117, %c0_118, %c0_119] : memref<32x8x128xf32, #tpu.memory_space<vmem>>, vector<1x8x128xf32>
    %177 = vector.shape_cast %176 : vector<1x8x128xf32> to vector<8x128xf32>
    %178 = vector.broadcast %175 : vector<1x128xf32> to vector<8x128xf32>
    %179 = arith.mulf %178, %177 : vector<8x128xf32>
    %180 = arith.addf %174, %179 : vector<8x128xf32>
    %c30 = arith.constant 30 : index
    %c0_120 = arith.constant 0 : index
    %181 = vector.load %arg1[%c30, %c0_120] : memref<32x128xf32, #tpu.memory_space<vmem>>, vector<1x128xf32>
    %c30_121 = arith.constant 30 : index
    %c0_122 = arith.constant 0 : index
    %c0_123 = arith.constant 0 : index
    %182 = vector.load %arg2[%c30_121, %c0_122, %c0_123] : memref<32x8x128xf32, #tpu.memory_space<vmem>>, vector<1x8x128xf32>
    %183 = vector.shape_cast %182 : vector<1x8x128xf32> to vector<8x128xf32>
    %184 = vector.broadcast %181 : vector<1x128xf32> to vector<8x128xf32>
    %185 = arith.mulf %184, %183 : vector<8x128xf32>
    %186 = arith.addf %180, %185 : vector<8x128xf32>
    %c31 = arith.constant 31 : index
    %c0_124 = arith.constant 0 : index
    %187 = vector.load %arg1[%c31, %c0_124] : memref<32x128xf32, #tpu.memory_space<vmem>>, vector<1x128xf32>
    %c31_125 = arith.constant 31 : index
    %c0_126 = arith.constant 0 : index
    %c0_127 = arith.constant 0 : index
    %188 = vector.load %arg2[%c31_125, %c0_126, %c0_127] : memref<32x8x128xf32, #tpu.memory_space<vmem>>, vector<1x8x128xf32>
    %189 = vector.shape_cast %188 : vector<1x8x128xf32> to vector<8x128xf32>
    %190 = vector.broadcast %187 : vector<1x128xf32> to vector<8x128xf32>
    %191 = arith.mulf %190, %189 : vector<8x128xf32>
    %192 = arith.addf %186, %191 : vector<8x128xf32>
    %cst_128 = arith.constant 0.176776692 : f32
    %193 = vector.broadcast %cst_128 : f32 to vector<8x128xf32>
    %194 = arith.mulf %192, %193 : vector<8x128xf32>
    %cst_129 = arith.constant dense<0xFF800000> : vector<128xf32>
    %195 = vector.multi_reduction <maximumf>, %194, %cst_129 [0] : vector<8x128xf32> to vector<128xf32>
    %196 = vector.shape_cast %195 : vector<128xf32> to vector<1x128xf32>
    %197 = vector.broadcast %196 : vector<1x128xf32> to vector<8x128xf32>
    %198 = arith.subf %194, %197 : vector<8x128xf32>
    %199 = math.exp %198 : vector<8x128xf32>
    %cst_130 = arith.constant dense<0.000000e+00> : vector<128xf32>
    %200 = vector.multi_reduction <add>, %199, %cst_130 [0] : vector<8x128xf32> to vector<128xf32>
    %201 = vector.shape_cast %200 : vector<128xf32> to vector<1x128xf32>
    %202 = tpu.reciprocal %201 {approx = true} : vector<1x128xf32> -> vector<1x128xf32>
    %203 = arith.mulf %201, %202 : vector<1x128xf32>
    %cst_131 = arith.constant 2.000000e+00 : f32
    %204 = vector.broadcast %cst_131 : f32 to vector<1x128xf32>
    %205 = arith.subf %204, %203 : vector<1x128xf32>
    %206 = arith.mulf %202, %205 : vector<1x128xf32>
    %207 = vector.broadcast %206 : vector<1x128xf32> to vector<8x128xf32>
    %208 = arith.mulf %199, %207 : vector<8x128xf32>
    %cst_132 = arith.constant 0.000000e+00 : f32
    %209 = vector.broadcast %cst_132 : f32 to vector<32x128xf32>
    %210 = vector.extract_strided_slice %208 {offsets = [0, 0], sizes = [1, 128], strides = [1, 1]} : vector<8x128xf32> to vector<1x128xf32>
    %c0_133 = arith.constant 0 : index
    %c0_134 = arith.constant 0 : index
    %c0_135 = arith.constant 0 : index
    %211 = vector.load %arg3[%c0_133, %c0_134, %c0_135] : memref<8x32x128xf32, #tpu.memory_space<vmem>>, vector<1x32x128xf32>
    %212 = vector.shape_cast %211 : vector<1x32x128xf32> to vector<32x128xf32>
    %213 = vector.broadcast %210 : vector<1x128xf32> to vector<32x128xf32>
    %214 = arith.mulf %213, %212 : vector<32x128xf32>
    %215 = arith.addf %209, %214 : vector<32x128xf32>
    %216 = vector.extract_strided_slice %208 {offsets = [1, 0], sizes = [1, 128], strides = [1, 1]} : vector<8x128xf32> to vector<1x128xf32>
    %c1_136 = arith.constant 1 : index
    %c0_137 = arith.constant 0 : index
    %c0_138 = arith.constant 0 : index
    %217 = vector.load %arg3[%c1_136, %c0_137, %c0_138] : memref<8x32x128xf32, #tpu.memory_space<vmem>>, vector<1x32x128xf32>
    %218 = vector.shape_cast %217 : vector<1x32x128xf32> to vector<32x128xf32>
    %219 = vector.broadcast %216 : vector<1x128xf32> to vector<32x128xf32>
    %220 = arith.mulf %219, %218 : vector<32x128xf32>
    %221 = arith.addf %215, %220 : vector<32x128xf32>
    %222 = vector.extract_strided_slice %208 {offsets = [2, 0], sizes = [1, 128], strides = [1, 1]} : vector<8x128xf32> to vector<1x128xf32>
    %c2_139 = arith.constant 2 : index
    %c0_140 = arith.constant 0 : index
    %c0_141 = arith.constant 0 : index
    %223 = vector.load %arg3[%c2_139, %c0_140, %c0_141] : memref<8x32x128xf32, #tpu.memory_space<vmem>>, vector<1x32x128xf32>
    %224 = vector.shape_cast %223 : vector<1x32x128xf32> to vector<32x128xf32>
    %225 = vector.broadcast %222 : vector<1x128xf32> to vector<32x128xf32>
    %226 = arith.mulf %225, %224 : vector<32x128xf32>
    %227 = arith.addf %221, %226 : vector<32x128xf32>
    %228 = vector.extract_strided_slice %208 {offsets = [3, 0], sizes = [1, 128], strides = [1, 1]} : vector<8x128xf32> to vector<1x128xf32>
    %c3_142 = arith.constant 3 : index
    %c0_143 = arith.constant 0 : index
    %c0_144 = arith.constant 0 : index
    %229 = vector.load %arg3[%c3_142, %c0_143, %c0_144] : memref<8x32x128xf32, #tpu.memory_space<vmem>>, vector<1x32x128xf32>
    %230 = vector.shape_cast %229 : vector<1x32x128xf32> to vector<32x128xf32>
    %231 = vector.broadcast %228 : vector<1x128xf32> to vector<32x128xf32>
    %232 = arith.mulf %231, %230 : vector<32x128xf32>
    %233 = arith.addf %227, %232 : vector<32x128xf32>
    %234 = vector.extract_strided_slice %208 {offsets = [4, 0], sizes = [1, 128], strides = [1, 1]} : vector<8x128xf32> to vector<1x128xf32>
    %c4_145 = arith.constant 4 : index
    %c0_146 = arith.constant 0 : index
    %c0_147 = arith.constant 0 : index
    %235 = vector.load %arg3[%c4_145, %c0_146, %c0_147] : memref<8x32x128xf32, #tpu.memory_space<vmem>>, vector<1x32x128xf32>
    %236 = vector.shape_cast %235 : vector<1x32x128xf32> to vector<32x128xf32>
    %237 = vector.broadcast %234 : vector<1x128xf32> to vector<32x128xf32>
    %238 = arith.mulf %237, %236 : vector<32x128xf32>
    %239 = arith.addf %233, %238 : vector<32x128xf32>
    %240 = vector.extract_strided_slice %208 {offsets = [5, 0], sizes = [1, 128], strides = [1, 1]} : vector<8x128xf32> to vector<1x128xf32>
    %c5_148 = arith.constant 5 : index
    %c0_149 = arith.constant 0 : index
    %c0_150 = arith.constant 0 : index
    %241 = vector.load %arg3[%c5_148, %c0_149, %c0_150] : memref<8x32x128xf32, #tpu.memory_space<vmem>>, vector<1x32x128xf32>
    %242 = vector.shape_cast %241 : vector<1x32x128xf32> to vector<32x128xf32>
    %243 = vector.broadcast %240 : vector<1x128xf32> to vector<32x128xf32>
    %244 = arith.mulf %243, %242 : vector<32x128xf32>
    %245 = arith.addf %239, %244 : vector<32x128xf32>
    %246 = vector.extract_strided_slice %208 {offsets = [6, 0], sizes = [1, 128], strides = [1, 1]} : vector<8x128xf32> to vector<1x128xf32>
    %c6_151 = arith.constant 6 : index
    %c0_152 = arith.constant 0 : index
    %c0_153 = arith.constant 0 : index
    %247 = vector.load %arg3[%c6_151, %c0_152, %c0_153] : memref<8x32x128xf32, #tpu.memory_space<vmem>>, vector<1x32x128xf32>
    %248 = vector.shape_cast %247 : vector<1x32x128xf32> to vector<32x128xf32>
    %249 = vector.broadcast %246 : vector<1x128xf32> to vector<32x128xf32>
    %250 = arith.mulf %249, %248 : vector<32x128xf32>
    %251 = arith.addf %245, %250 : vector<32x128xf32>
    %252 = vector.extract_strided_slice %208 {offsets = [7, 0], sizes = [1, 128], strides = [1, 1]} : vector<8x128xf32> to vector<1x128xf32>
    %c7_154 = arith.constant 7 : index
    %c0_155 = arith.constant 0 : index
    %c0_156 = arith.constant 0 : index
    %253 = vector.load %arg3[%c7_154, %c0_155, %c0_156] : memref<8x32x128xf32, #tpu.memory_space<vmem>>, vector<1x32x128xf32>
    %254 = vector.shape_cast %253 : vector<1x32x128xf32> to vector<32x128xf32>
    %255 = vector.broadcast %252 : vector<1x128xf32> to vector<32x128xf32>
    %256 = arith.mulf %255, %254 : vector<32x128xf32>
    %257 = arith.addf %251, %256 : vector<32x128xf32>
    %c0_157 = arith.constant 0 : index
    %c0_158 = arith.constant 0 : index
    %258 = vector.load %arg4[%c0_157, %c0_158] : memref<32x128xf32, #tpu.memory_space<vmem>>, vector<32x128xf32>
    tpu.vector_store %arg4[%c0_157, %c0_158], %257 {strides = array<i32>} : memref<32x128xf32, #tpu.memory_space<vmem>>, vector<32x128xf32>,
    %c0_159 = arith.constant 0 : index
    %c0_160 = arith.constant 0 : index
    %259 = vector.load %arg5[%c0_159, %c0_160] : memref<8x128xf32, #tpu.memory_space<vmem>>, vector<8x128xf32>
    tpu.vector_store %arg5[%c0_159, %c0_160], %208 {strides = array<i32>} : memref<8x128xf32, #tpu.memory_space<vmem>>, vector<8x128xf32>,
    return
  }
  func.func @transform_0(%arg0: i32) -> (i32, i32) {
    %c0_i32 = arith.constant 0 : i32
    %c0_i32_0 = arith.constant 0 : i32
    return %c0_i32, %arg0 : i32, i32
  }
  func.func @transform_1(%arg0: i32) -> (i32, i32, i32) {
    %c0_i32 = arith.constant 0 : i32
    %c0_i32_0 = arith.constant 0 : i32
    %c0_i32_1 = arith.constant 0 : i32
    return %c0_i32, %c0_i32_0, %arg0 : i32, i32, i32
  }
  func.func @transform_2(%arg0: i32) -> (i32, i32, i32) {
    %c0_i32 = arith.constant 0 : i32
    %c0_i32_0 = arith.constant 0 : i32
    %c0_i32_1 = arith.constant 0 : i32
    return %c0_i32, %c0_i32_0, %arg0 : i32, i32, i32
  }
  func.func @transform_3(%arg0: i32) -> (i32, i32) {
    %c0_i32 = arith.constant 0 : i32
    %c0_i32_0 = arith.constant 0 : i32
    return %c0_i32, %arg0 : i32, i32
  }
  func.func @transform_4(%arg0: i32) -> (i32, i32) {
    %c0_i32 = arith.constant 0 : i32
    %c0_i32_0 = arith.constant 0 : i32
    return %c0_i32, %arg0 : i32, i32
  }
}

</mosaic_0001>

<bundles_post_ra>
// kernel: tpu_custom_call.1
= control target key start
LH: loop header
LB: loop body
LE: loop exit
PB: predicated region body
PF: predicated region fallthrough
CT: control target
= control target key end

     0   :  { %10 = vsyncpa [#allocation3], 0  ;;  %s863_s0 = inlined_call_operand.hbm [shape: f32[32,128], index: 0, kind: input, shape index: {}]   ;;  %s864_s1 = inlined_call_operand.hbm [shape: f32[32,8,128], index: 1, kind: input, shape index: {}]   ;;  %s865_s2 = inlined_call_operand.hbm [shape: f32[8,32,128], index: 2, kind: input, shape index: {}]   ;;  %s866_s3 = inlined_call_operand.hbm [shape: f32[32,128], index: 3, kind: output, shape index: {0}]   ;;  %s867_s4 = inlined_call_operand.hbm [shape: f32[8,128], index: 4, kind: output, shape index: {1}]  }
   0x1   :  { %11 = vsyncpa [#allocation6], 0 }
   0x2   :  { %12 = vsyncpa [#allocation4], 0 }
   0x3   :  { %13 = vsyncpa [#allocation10], 0  ;;  %s700_s15 = smov [#allocation5]   ;;  %s701_s17 = smov [#allocation2]  }
   0x4   :  { %s31_s16 = sshll.u32 %s700_s15, 4  ;;  %s19_s18 = sshll.u32 %s701_s17, 4  ;;  %s32_s16 = int_to_ptr.vmem [resolvable:$true] %s31_s16  ;;  %s732_s18 = int_to_ptr.vmem [resolvable:$true] %s19_s18 }
   0x5   :  { %s582_s21 = scalar_lea.hbm %s864_s1, 4096 }
   0x6   :  { %p583_p0 = scmp.ne.s32.totalorder %s864_s1, %s582_s21  ;;  %p586_p1 = scmp.lt.u32.totalorder %s582_s21, %s864_s1 }
   0x8   :  { %p588_p2 = pnand %p586_p1, %p583_p0 }
   0xa   :  { %591 = shalt.err (!%p588_p2)
}
   0xb   :  { %s592_s26 = scalar_lea.vmem %s32_s16, 4096  ;;  %p597_p4 = scmp.lt.s32.totalorder %s32_s16, %s32_s16 }
   0xc   :  { %p593_p3 = scmp.ne.s32.totalorder %s32_s16, %s592_s26  ;;  %p598_p5 = scmp.lt.s32.totalorder %s592_s26, %s592_s26 }
   0xe   :  { %p599_p6 = por %p598_p5, %p597_p4 }
  0x10   :  { %p600_p7 = pnand %p599_p6, %p593_p3 }
  0x12   :  { %603 = shalt.err (!%p600_p7)
}
  0x13   :  { %s702_s27 = smov 128   ;;  %s703_s28 = smov 8  }
  0x14   :  { %37 = dma.hbm_to_vmem [thread:$0]  %s864_s1, 4096, %s32_s16, [#allocation6], %s702_s27, %s702_s27, %s703_s28  }
  0x15   :  { %s604_s7 = scalar_lea.hbm %s863_s0, 512 }
  0x16   :  { %p605_p8 = scmp.ne.s32.totalorder %s863_s0, %s604_s7  ;;  %p608_p9 = scmp.lt.u32.totalorder %s604_s7, %s863_s0 }
  0x18   :  { %p610_p10 = pnand %p608_p9, %p605_p8 }
  0x1a   :  { %613 = shalt.err (!%p610_p10)
}
  0x1b   :  { %s614_s12 = scalar_lea.vmem %s732_s18, 512  ;;  %p619_p12 = scmp.lt.s32.totalorder %s732_s18, %s732_s18 }
  0x1c   :  { %p615_p11 = scmp.ne.s32.totalorder %s732_s18, %s614_s12  ;;  %p620_p13 = scmp.lt.s32.totalorder %s614_s12, %s614_s12 }
  0x1e   :  { %p621_p0 = por %p620_p13, %p619_p12 }
  0x20   :  { %p622_p1 = pnand %p621_p0, %p615_p11 }
  0x22   :  { %625 = shalt.err (!%p622_p1)
}
  0x23   :  { %25 = dma.hbm_to_vmem [thread:$0]  %s863_s0, 512, %s732_s18, [#allocation3], %s702_s27, %s702_s27, %s703_s28  }
  0x24   :  { %s704_s14 = smov [#allocation7]   ;;  %s626_s19 = scalar_lea.hbm %s865_s2, 4096 }
  0x25   :  { %s43_s15 = sshll.u32 %s704_s14, 4  ;;  %p627_p2 = scmp.ne.s32.totalorder %s865_s2, %s626_s19  ;;  %s44_s15 = int_to_ptr.vmem [resolvable:$true] %s43_s15 }
  0x26   :  { %p630_p3 = scmp.lt.u32.totalorder %s626_s19, %s865_s2 }
  0x28   :  { %p632_p4 = pnand %p630_p3, %p627_p2 }
  0x2a   :  { %635 = shalt.err (!%p632_p4)
}
  0x2b   :  { %s636_s24 = scalar_lea.vmem %s44_s15, 4096  ;;  %p641_p6 = scmp.lt.s32.totalorder %s44_s15, %s44_s15 }
  0x2c   :  { %p637_p5 = scmp.ne.s32.totalorder %s44_s15, %s636_s24  ;;  %p642_p7 = scmp.lt.s32.totalorder %s636_s24, %s636_s24 }
  0x2e   :  { %p643_p8 = por %p642_p7, %p641_p6 }
  0x30   :  { %p644_p9 = pnand %p643_p8, %p637_p5 }
  0x32   :  { %647 = shalt.err (!%p644_p9)
}
  0x33   :  { %49 = dma.hbm_to_vmem [thread:$0]  %s865_s2, 4096, %s44_s15, [#allocation6], %s702_s27, %s702_s27, %s703_s28  }
  0x34   :  { %692 = dma.done.wait [#allocation3], 512  }
  0x35   :  { %693 = vsyncadd [#allocation3], 4294966784 }
  0x36   :  { %694 = dma.done.wait [#allocation6], 8192  }
  0x37   :  { %695 = vsyncadd [#allocation6], 4294959104  ;;  %v539_v0 = vld [vmem:[#allocation2] ss:$0 sm:$0xff]  ;;  %v540_v2 = vld [vmem:[#allocation2 + $0x1] ss:$0 sm:$0xff] }
  0x38   :  { %v60_v1 = vld [vmem:[#allocation5] sm:$0xff]  ;;  %v69_v4 = vld [vmem:[#allocation5 + $0x8] sm:$0xff]  ;;  %v78_v6 = vld [vmem:[#allocation5 + $0x10] sm:$0xff]  ;;  %s705_s2 = smov [#allocation9]  }
  0x39   :  { %v65_v3 = vmul.f32 %v539_v0, %v60_v1  ;;  %v541_v5 = vld [vmem:[#allocation2 + $0x2] ss:$0 sm:$0xff]  ;;  %v74_v7 = vmul.f32 %v540_v2, %v69_v4  ;;  %v542_v9 = vld [vmem:[#allocation2 + $0x3] ss:$0 sm:$0xff]  ;;  %v87_v10 = vld [vmem:[#allocation5 + $0x18] sm:$0xff]  ;;  %s525_s25 = sshll.u32 %s705_s2, 4  ;;  %s526_s25 = int_to_ptr.vmem [resolvable:$true] %s525_s25 }
  0x3a   :  { %v83_v8 = vmul.f32 %v541_v5, %v78_v6  ;;  %v543_v11 = vld [vmem:[#allocation2 + $0x4] ss:$0 sm:$0xff]  ;;  %v92_v14 = vmul.f32 %v542_v9, %v87_v10  ;;  %v544_v15 = vld [vmem:[#allocation2 + $0x5] ss:$0 sm:$0xff]  ;;  %v105_v16 = vld [vmem:[#allocation5 + $0x28] sm:$0xff]  ;;  %s648_s26 = scalar_lea.vmem %s526_s25, 128  ;;  %p653_p11 = scmp.lt.s32.totalorder %s526_s25, %s526_s25 }
  0x3b   :  { %v96_v12 = vld [vmem:[#allocation5 + $0x20] sm:$0xff]  ;;  %v75_v13 = vadd.f32 %v74_v7, %v65_v3  ;;  %v114_v20 = vld [vmem:[#allocation5 + $0x30] sm:$0xff]  ;;  %v110_v22 = vmul.f32 %v544_v15, %v105_v16  ;;  %v123_v24 = vld [vmem:[#allocation5 + $0x38] sm:$0xff]  ;;  %p649_p10 = scmp.ne.s32.totalorder %s526_s25, %s648_s26  ;;  %p654_p12 = scmp.lt.s32.totalorder %s648_s26, %s648_s26 }
  0x3c   :  { %v101_v18 = vmul.f32 %v543_v11, %v96_v12  ;;  %v545_v19 = vld [vmem:[#allocation2 + $0x6] ss:$0 sm:$0xff]  ;;  %v546_v23 = vld [vmem:[#allocation2 + $0x7] ss:$0 sm:$0xff]  ;;  %v547_v27 = vld [vmem:[#allocation2 + $0x8] ss:$0 sm:$0xff] }
  0x3d   :  { %v84_v17 = vadd.f32 %v83_v8, %v75_v13  ;;  %v119_v26 = vmul.f32 %v545_v19, %v114_v20  ;;  %v132_v28 = vld [vmem:[#allocation5 + $0x40] sm:$0xff]  ;;  %v128_v30 = vmul.f32 %v546_v23, %v123_v24  ;;  %v548_v31 = vld [vmem:[#allocation2 + $0x9] ss:$0 sm:$0xff]  ;;  %v549_v35 = vld [vmem:[#allocation2 + $0xa] ss:$0 sm:$0xff]  ;;  %p655_p13 = por %p654_p12, %p653_p11 }
  0x3e   :  { %v141_v32 = vld [vmem:[#allocation5 + $0x48] sm:$0xff]  ;;  %v137_v34 = vmul.f32 %v547_v27, %v132_v28  ;;  %v150_v36 = vld [vmem:[#allocation5 + $0x50] sm:$0xff]  ;;  %v159_v40 = vld [vmem:[#allocation5 + $0x58] sm:$0xff] }
  0x3f   :  { %v93_v21 = vadd.f32 %v92_v14, %v84_v17  ;;  %v146_v38 = vmul.f32 %v548_v31, %v141_v32  ;;  %v550_v39 = vld [vmem:[#allocation2 + $0xb] ss:$0 sm:$0xff]  ;;  %v155_v42 = vmul.f32 %v549_v35, %v150_v36  ;;  %v551_v43 = vld [vmem:[#allocation2 + $0xc] ss:$0 sm:$0xff]  ;;  %v168_v44 = vld [vmem:[#allocation5 + $0x60] sm:$0xff]  ;;  %p656_p0 = pnand %p655_p13, %p649_p10 }
  0x40   :  { %v164_v46 = vmul.f32 %v550_v39, %v159_v40  ;;  %v552_v47 = vld [vmem:[#allocation2 + $0xd] ss:$0 sm:$0xff]  ;;  %v173_v50 = vmul.f32 %v551_v43, %v168_v44  ;;  %v553_v51 = vld [vmem:[#allocation2 + $0xe] ss:$0 sm:$0xff]  ;;  %v186_v52 = vld [vmem:[#allocation5 + $0x70] sm:$0xff] }
  0x41   :  { %v102_v25 = vadd.f32 %v101_v18, %v93_v21  ;;  %v177_v48 = vld [vmem:[#allocation5 + $0x68] sm:$0xff]  ;;  %v195_v56 = vld [vmem:[#allocation5 + $0x78] sm:$0xff]  ;;  %v191_v58 = vmul.f32 %v553_v51, %v186_v52  ;;  %v555_v59 = vld [vmem:[#allocation2 + $0x10] ss:$0 sm:$0xff] }
  0x42   :  { %v182_v54 = vmul.f32 %v552_v47, %v177_v48  ;;  %v554_v55 = vld [vmem:[#allocation2 + $0xf] ss:$0 sm:$0xff]  ;;  %v204_v60 = vld [vmem:[#allocation5 + $0x80] sm:$0xff]  ;;  %v556_v63 = vld [vmem:[#allocation2 + $0x11] ss:$0 sm:$0xff] }
  0x43   :  { %v111_v29 = vadd.f32 %v110_v22, %v102_v25  ;;  %v200_v62 = vmul.f32 %v554_v55, %v195_v56  ;;  %v213_v0 = vld [vmem:[#allocation5 + $0x88] sm:$0xff]  ;;  %v209_v2 = vmul.f32 %v555_v59, %v204_v60  ;;  %v557_v3 = vld [vmem:[#allocation2 + $0x12] ss:$0 sm:$0xff]  ;;  %v558_v7 = vld [vmem:[#allocation2 + $0x13] ss:$0 sm:$0xff] }
  0x44   :  { %v222_v4 = vld [vmem:[#allocation5 + $0x90] sm:$0xff]  ;;  %v218_v6 = vmul.f32 %v556_v63, %v213_v0  ;;  %v231_v8 = vld [vmem:[#allocation5 + $0x98] sm:$0xff]  ;;  %v240_v12 = vld [vmem:[#allocation5 + $0xa0] sm:$0xff] }
  0x45   :  { %v120_v33 = vadd.f32 %v119_v26, %v111_v29  ;;  %v227_v10 = vmul.f32 %v557_v3, %v222_v4  ;;  %v559_v11 = vld [vmem:[#allocation2 + $0x14] ss:$0 sm:$0xff]  ;;  %v236_v14 = vmul.f32 %v558_v7, %v231_v8  ;;  %v560_v15 = vld [vmem:[#allocation2 + $0x15] ss:$0 sm:$0xff]  ;;  %v249_v16 = vld [vmem:[#allocation5 + $0xa8] sm:$0xff] }
  0x46   :  { %v245_v18 = vmul.f32 %v559_v11, %v240_v12  ;;  %v561_v19 = vld [vmem:[#allocation2 + $0x16] ss:$0 sm:$0xff]  ;;  %v254_v22 = vmul.f32 %v560_v15, %v249_v16  ;;  %v562_v23 = vld [vmem:[#allocation2 + $0x17] ss:$0 sm:$0xff]  ;;  %v267_v24 = vld [vmem:[#allocation5 + $0xb8] sm:$0xff]  ;;  %v371_v15 = vlaneseq }
  0x47   :  { %v129_v37 = vadd.f32 %v128_v30, %v120_v33  ;;  %v258_v20 = vld [vmem:[#allocation5 + $0xb0] sm:$0xff]  ;;  %v563_v27 = vld [vmem:[#allocation2 + $0x18] ss:$0 sm:$0xff]  ;;  %v276_v28 = vld [vmem:[#allocation5 + $0xc0] sm:$0xff]  ;;  %v272_v30 = vmul.f32 %v562_v23, %v267_v24 }
  0x48   :  { %v263_v26 = vmul.f32 %v561_v19, %v258_v20  ;;  %v564_v31 = vld [vmem:[#allocation2 + $0x19] ss:$0 sm:$0xff]  ;;  %v285_v32 = vld [vmem:[#allocation5 + $0xc8] sm:$0xff]  ;;  %v565_v35 = vld [vmem:[#allocation2 + $0x1a] ss:$0 sm:$0xff] }
  0x49   :  { %v138_v41 = vadd.f32 %v137_v34, %v129_v37  ;;  %v281_v34 = vmul.f32 %v563_v27, %v276_v28  ;;  %v294_v36 = vld [vmem:[#allocation5 + $0xd0] sm:$0xff]  ;;  %v566_v39 = vld [vmem:[#allocation2 + $0x1b] ss:$0 sm:$0xff]  ;;  %v567_v43 = vld [vmem:[#allocation2 + $0x1c] ss:$0 sm:$0xff] }
  0x4a   :  { %v303_v40 = vld [vmem:[#allocation5 + $0xd8] sm:$0xff]  ;;  %v312_v44 = vld [vmem:[#allocation5 + $0xe0] sm:$0xff]  ;;  %v321_v48 = vld [vmem:[#allocation5 + $0xe8] sm:$0xff] }
  0x4b   :  { %v147_v45 = vadd.f32 %v146_v38, %v138_v41  ;;  %v290_v38 = vmul.f32 %v564_v31, %v285_v32  ;;  %v568_v47 = vld [vmem:[#allocation2 + $0x1d] ss:$0 sm:$0xff]  ;;  %v569_v51 = vld [vmem:[#allocation2 + $0x1e] ss:$0 sm:$0xff]  ;;  %v330_v52 = vld [vmem:[#allocation5 + $0xf0] sm:$0xff] }
  0x4c   :  { %v570_v55 = vld [vmem:[#allocation2 + $0x1f] ss:$0 sm:$0xff]  ;;  %v367_v27 = vld [vmem:[#allocation7] sm:$0xff] }
  0x4d   :  { %v156_v49 = vadd.f32 %v155_v42, %v147_v45  ;;  %v299_v42 = vmul.f32 %v565_v35, %v294_v36  ;;  %v339_v56 = vld [vmem:[#allocation5 + $0xf8] sm:$0xff]  ;;  %v384_v28 = vld [vmem:[#allocation7 + $0x20] sm:$0xff] }
  0x4e   :  { %v344_v60 = vmul.f32 %v570_v55, %v339_v56  ;;  %v418_v35 = vld [vmem:[#allocation7 + $0x60] sm:$0xff] }
  0x4f   :  { %v165_v53 = vadd.f32 %v164_v46, %v156_v49  ;;  %v308_v46 = vmul.f32 %v566_v39, %v303_v40  ;;  %v385_v39 = vld [vmem:[#allocation7 + $0x28] sm:$0xff] }
  0x50   :  { %v402_v40 = vld [vmem:[#allocation7 + $0x48] sm:$0xff] }
  0x51   :  { %v174_v57 = vadd.f32 %v173_v50, %v165_v53  ;;  %v317_v50 = vmul.f32 %v567_v43, %v312_v44 }
  0x53   :  { %v183_v61 = vadd.f32 %v182_v54, %v174_v57  ;;  %v326_v54 = vmul.f32 %v568_v47, %v321_v48 }
  0x55   :  { %v192_v1 = vadd.f32 %v191_v58, %v183_v61  ;;  %v335_v58 = vmul.f32 %v569_v51, %v330_v52 }
  0x57   :  { %v201_v5 = vadd.f32 %v200_v62, %v192_v1 }
  0x59   :  { %v210_v9 = vadd.f32 %v209_v2, %v201_v5 }
  0x5b   :  { %v219_v13 = vadd.f32 %v218_v6, %v210_v9 }
  0x5d   :  { %v228_v17 = vadd.f32 %v227_v10, %v219_v13 }
  0x5f   :  { %v237_v21 = vadd.f32 %v236_v14, %v228_v17  ;;  %v784_v17 = vshrl.u32 %v371_v15, 7 }
  0x61   :  { %v246_v25 = vadd.f32 %v245_v18, %v237_v21  ;;  %v373_v20 = vsub.s32 0, %v784_v17  ;;  %v407_v23 = vsub.s32 2, %v784_v17  ;;  %v424_v24 = vsub.s32 3, %v784_v17 }
  0x62   :  { %v475_v31 = vsub.s32 6, %v784_v17 }
  0x63   :  { %v255_v29 = vadd.f32 %v254_v22, %v246_v25  ;;  %v390_v22 = vsub.s32 1, %v784_v17  ;;  %v441_v25 = vsub.s32 4, %v784_v17 }
  0x65   :  { %v264_v33 = vadd.f32 %v263_v26, %v255_v29  ;;  %v401_v29 = vld [vmem:[#allocation7 + $0x40] sm:$0xff] }
  0x67   :  { %v273_v37 = vadd.f32 %v272_v30, %v264_v33  ;;  %v458_v30 = vsub.s32 5, %v784_v17 }
  0x69   :  { %v282_v41 = vadd.f32 %v281_v34, %v273_v37 }
  0x6b   :  { %v291_v45 = vadd.f32 %v290_v38, %v282_v41  ;;  %v368_v38 = vld [vmem:[#allocation7 + $0x8] sm:$0xff] }
  0x6d   :  { %v300_v49 = vadd.f32 %v299_v42, %v291_v45 }
  0x6f   :  { %v309_v53 = vadd.f32 %v308_v46, %v300_v49 }
  0x71   :  { %v318_v57 = vadd.f32 %v317_v50, %v309_v53 }
  0x73   :  { %v327_v59 = vadd.f32 %v326_v54, %v318_v57 }
  0x75   :  { %v336_v61 = vadd.f32 %v335_v58, %v327_v59 }
  0x77   :  { %v345_v62 = vadd.f32 %v344_v60, %v336_v61 }
  0x79   :  { %v346_v63 = vmul.f32 0.17677669, %v345_v62 }
  0x7b   :  { %v347_v0 = vrot.slane %v346_v63, 4 }
  0x7d   :  { %v348_v1 = vmax.f32 %v346_v63, %v347_v0 }
  0x7f   :  { %v349_v2 = vrot.slane %v348_v1, 2 }
  0x81   :  { %v350_v3 = vmax.f32 %v348_v1, %v349_v2 }
  0x83   :  { %v351_v4 = vrot.slane %v350_v3, 1 }
  0x85   :  { %v352_v5 = vmax.f32 %v350_v3, %v351_v4 }
  0x87   :  { %v353_v6 = vsub.f32 %v346_v63, %v352_v5 }
  0x89   :  { %v354_v7 = vmul.f32 1.442695, %v353_v6 }
  0x8b   :  { %578 = vpow2.f32 %v354_v7 }
  0x95   :  { %v579_v8 = vpop.eup %578 }
  0x96   :  { %v356_v9 = vrot.slane %v579_v8, 4 }
  0x98   :  { %v357_v10 = vadd.f32 %v579_v8, %v356_v9 }
  0x9a   :  { %v358_v11 = vrot.slane %v357_v10, 2 }
  0x9c   :  { %v359_v12 = vadd.f32 %v358_v11, %v357_v10 }
  0x9e   :  { %v360_v13 = vrot.slane %v359_v12, 1 }
  0xa0   :  { %v361_v14 = vadd.f32 %v360_v13, %v359_v12 }
  0xa2   :  { %580 = vrcp.f32 %v361_v14 }
  0xac   :  { %v581_v16 = vpop.eup %580 }
  0xad   :  { %v363_v18 = vmul.f32 %v581_v16, %v361_v14 }
  0xaf   :  { %v364_v19 = vsub.f32 2.0, %v363_v18 }
  0xb1   :  { %v365_v21 = vmul.f32 %v581_v16, %v364_v19 }
  0xb3   :  { %v366_v26 = vmul.f32 %v579_v8, %v365_v21 }
  0xb5   :  { %v793_v32 = vrot.slane %v366_v26, %v373_v20  ;;  %v795_v33 = vrot.slane %v366_v26, %v390_v22  ;;  %v797_v34 = vrot.slane %v366_v26, %v407_v23  ;;  %v799_v36 = vrot.slane %v366_v26, %v424_v24  ;;  %506 = vst [vmem:[#allocation9] sm:$0xff] %v366_v26 }
  0xb6   :  { %v801_v37 = vrot.slane %v366_v26, %v441_v25 }
  0xb7   :  { %659 = shalt.err (!%p656_p0)
}
  0xb8   :  { %s660_s5 = scalar_lea.hbm %s867_s4, 128 }
  0xb9   :  { %p661_p1 = scmp.ne.s32.totalorder %s867_s4, %s660_s5  ;;  %p664_p2 = scmp.lt.u32.totalorder %s660_s5, %s867_s4 }
  0xbb   :  { %p666_p3 = pnand %p664_p2, %p661_p1 }
  0xbd   :  { %669 = shalt.err (!%p666_p3)
}
  0xbe   :  { %528 = dma.vmem_to_hbm [thread:$0]  %s526_s25, 128, %s867_s4, [#allocation10]   ;;  %v375_v41 = vmul.f32 %v793_v32, %v367_v27  ;;  %v392_v42 = vmul.f32 %v795_v33, %v384_v28  ;;  %v409_v43 = vmul.f32 %v797_v34, %v401_v29  ;;  %v435_v44 = vld [vmem:[#allocation7 + $0x80] sm:$0xff]  ;;  %v426_v45 = vmul.f32 %v799_v36, %v418_v35  ;;  %v419_v49 = vld [vmem:[#allocation7 + $0x68] sm:$0xff]  ;;  %v369_v50 = vld [vmem:[#allocation7 + $0x10] sm:$0xff] }
  0xbf   :  { %v819_v46 = vrot.slane %v366_v26, %v458_v30  ;;  %v821_v47 = vrot.slane %v366_v26, %v475_v31  ;;  %v492_v48 = vsub.s32 7, %v784_v17  ;;  %v452_v52 = vld [vmem:[#allocation7 + $0xa0] sm:$0xff]  ;;  %v376_v53 = vmul.f32 %v793_v32, %v368_v38  ;;  %v386_v56 = vld [vmem:[#allocation7 + $0x30] sm:$0xff]  ;;  %v436_v60 = vld [vmem:[#allocation7 + $0x88] sm:$0xff]  ;;  %s706_s4 = smov [#allocation8]  }
  0xc0   :  { %v396_v51 = vadd.f32 %v392_v42, %v375_v41  ;;  %v393_v54 = vmul.f32 %v795_v33, %v385_v39  ;;  %v410_v55 = vmul.f32 %v797_v34, %v402_v40  ;;  %v403_v57 = vld [vmem:[#allocation7 + $0x50] sm:$0xff]  ;;  %v443_v58 = vmul.f32 %v801_v37, %v435_v44  ;;  %v469_v59 = vld [vmem:[#allocation7 + $0xc0] sm:$0xff]  ;;  %v370_v2 = vld [vmem:[#allocation7 + $0x18] sm:$0xff]  ;;  %s512_s12 = sshll.u32 %s706_s4, 4  ;;  %s513_s12 = int_to_ptr.vmem [resolvable:$true] %s512_s12 }
  0xc1   :  { %v427_v63 = vmul.f32 %v799_v36, %v419_v49  ;;  %v377_v0 = vmul.f32 %v793_v32, %v369_v50  ;;  %v420_v1 = vld [vmem:[#allocation7 + $0x70] sm:$0xff]  ;;  %v387_v3 = vld [vmem:[#allocation7 + $0x38] sm:$0xff]  ;;  %v460_v4 = vmul.f32 %v819_v46, %v452_v52  ;;  %v493_v5 = vrot.slane %v366_v26, %v492_v48  ;;  %v453_v6 = vld [vmem:[#allocation7 + $0xa8] sm:$0xff]  ;;  %s670_s1 = scalar_lea.vmem %s513_s12, 512  ;;  %p675_p5 = scmp.lt.s32.totalorder %s513_s12, %s513_s12 }
  0xc2   :  { %v413_v61 = vadd.f32 %v409_v43, %v396_v51  ;;  %v397_v62 = vadd.f32 %v393_v54, %v376_v53  ;;  %v394_v7 = vmul.f32 %v795_v33, %v386_v56  ;;  %v411_v8 = vmul.f32 %v797_v34, %v403_v57  ;;  %v404_v9 = vld [vmem:[#allocation7 + $0x58] sm:$0xff]  ;;  %v437_v14 = vld [vmem:[#allocation7 + $0x90] sm:$0xff]  ;;  %v486_v16 = vld [vmem:[#allocation7 + $0xe0] sm:$0xff]  ;;  %p671_p4 = scmp.ne.s32.totalorder %s513_s12, %s670_s1  ;;  %p676_p6 = scmp.lt.s32.totalorder %s670_s1, %s670_s1 }
  0xc3   :  { %v477_v11 = vmul.f32 %v821_v47, %v469_v59  ;;  %v444_v13 = vmul.f32 %v801_v37, %v436_v60  ;;  %v421_v15 = vld [vmem:[#allocation7 + $0x78] sm:$0xff]  ;;  %v470_v17 = vld [vmem:[#allocation7 + $0xc8] sm:$0xff]  ;;  %v428_v19 = vmul.f32 %v799_v36, %v420_v1  ;;  %v378_v20 = vmul.f32 %v793_v32, %v370_v2  ;;  %v454_v25 = vld [vmem:[#allocation7 + $0xb0] sm:$0xff] }
  0xc4   :  { %v430_v10 = vadd.f32 %v426_v45, %v413_v61  ;;  %v414_v12 = vadd.f32 %v410_v55, %v397_v62  ;;  %v398_v18 = vadd.f32 %v394_v7, %v377_v0  ;;  %v395_v21 = vmul.f32 %v795_v33, %v387_v3  ;;  %v438_v27 = vld [vmem:[#allocation7 + $0x98] sm:$0xff]  ;;  %v487_v28 = vld [vmem:[#allocation7 + $0xe8] sm:$0xff]  ;;  %v471_v40 = vld [vmem:[#allocation7 + $0xd0] sm:$0xff]  ;;  %p677_p7 = por %p676_p6, %p675_p5 }
  0xc5   :  { %v461_v24 = vmul.f32 %v819_v46, %v453_v6  ;;  %v412_v26 = vmul.f32 %v797_v34, %v404_v9  ;;  %v445_v30 = vmul.f32 %v801_v37, %v437_v14  ;;  %v429_v35 = vmul.f32 %v799_v36, %v421_v15  ;;  %v455_v41 = vld [vmem:[#allocation7 + $0xb8] sm:$0xff]  ;;  %v488_v50 = vld [vmem:[#allocation7 + $0xf0] sm:$0xff] }
  0xc6   :  { %v447_v22 = vadd.f32 %v443_v58, %v430_v10  ;;  %v431_v23 = vadd.f32 %v427_v63, %v414_v12  ;;  %v415_v29 = vadd.f32 %v411_v8, %v398_v18  ;;  %v399_v31 = vadd.f32 %v395_v21, %v378_v20  ;;  %v472_v51 = vld [vmem:[#allocation7 + $0xd8] sm:$0xff]  ;;  %p678_p8 = pnand %p677_p7, %p671_p4 }
  0xc7   :  { %v494_v39 = vmul.f32 %v493_v5, %v486_v16  ;;  %v478_v33 = vmul.f32 %v821_v47, %v470_v17  ;;  %v462_v43 = vmul.f32 %v819_v46, %v454_v25  ;;  %v446_v34 = vmul.f32 %v801_v37, %v438_v27  ;;  %v489_v57 = vld [vmem:[#allocation7 + $0xf8] sm:$0xff] }
  0xc8   :  { %v464_v38 = vadd.f32 %v460_v4, %v447_v22  ;;  %v448_v32 = vadd.f32 %v444_v13, %v431_v23  ;;  %v432_v42 = vadd.f32 %v428_v19, %v415_v29  ;;  %v416_v44 = vadd.f32 %v412_v26, %v399_v31 }
  0xc9   :  { %v495_v49 = vmul.f32 %v493_v5, %v487_v28  ;;  %v479_v36 = vmul.f32 %v821_v47, %v471_v40  ;;  %v463_v54 = vmul.f32 %v819_v46, %v455_v41  ;;  %v496_v59 = vmul.f32 %v493_v5, %v488_v50 }
  0xca   :  { %v481_v45 = vadd.f32 %v477_v11, %v464_v38  ;;  %v465_v48 = vadd.f32 %v461_v24, %v448_v32  ;;  %v449_v52 = vadd.f32 %v445_v30, %v432_v42  ;;  %v433_v53 = vadd.f32 %v429_v35, %v416_v44 }
  0xcb   :  { %v480_v61 = vmul.f32 %v821_v47, %v472_v51  ;;  %v497_v0 = vmul.f32 %v493_v5, %v489_v57 }
  0xcc   :  { %v498_v55 = vadd.f32 %v494_v39, %v481_v45  ;;  %v482_v56 = vadd.f32 %v478_v33, %v465_v48  ;;  %v466_v58 = vadd.f32 %v462_v43, %v449_v52  ;;  %v450_v60 = vadd.f32 %v446_v34, %v433_v53 }
  0xce   :  { %502 = vst [vmem:[#allocation8] sm:$0xff] %v498_v55  ;;  %v499_v37 = vadd.f32 %v495_v49, %v482_v56  ;;  %v483_v62 = vadd.f32 %v479_v36, %v466_v58  ;;  %v467_v63 = vadd.f32 %v463_v54, %v450_v60 }
  0xd0   :  { %503 = vst [vmem:[#allocation8 + $0x8] sm:$0xff] %v499_v37  ;;  %v500_v1 = vadd.f32 %v496_v59, %v483_v62  ;;  %v484_v2 = vadd.f32 %v480_v61, %v467_v63 }
  0xd2   :  { %504 = vst [vmem:[#allocation8 + $0x10] sm:$0xff] %v500_v1  ;;  %v501_v46 = vadd.f32 %v497_v0, %v484_v2 }
  0xd4   :  { %505 = vst [vmem:[#allocation8 + $0x18] sm:$0xff] %v501_v46 }
  0xd5   :  { %681 = shalt.err (!%p678_p8)
}
  0xd6   :  { %s682_s15 = scalar_lea.hbm %s866_s3, 512 }
  0xd7   :  { %p683_p9 = scmp.ne.s32.totalorder %s866_s3, %s682_s15  ;;  %p686_p10 = scmp.lt.u32.totalorder %s682_s15, %s866_s3 }
  0xd9   :  { %p688_p11 = pnand %p686_p10, %p683_p9 }
  0xdb   :  { %691 = shalt.err (!%p688_p11)
}
  0xdc   :  { %518 = dma.vmem_to_hbm [thread:$0]  %s513_s12, 512, %s866_s3, [#allocation4], %s702_s27, %s702_s27, %s703_s28  }
  0xdd   :  { %696 = dma.done.wait [#allocation4], 512  }
  0xde   :  { %697 = vsyncadd [#allocation4], 4294966784 }
  0xdf   :  { %698 = dma.done.wait [#allocation10], 128  }
  0xe0   :  { %699 = vsyncadd [#allocation10], 4294967168 }
  0xe1   :  { %535 = vsyncpa [#allocation3], 1 }
  0xe2   :  { %536 = vsyncpa [#allocation6], 1 }
  0xe3   :  { %537 = vsyncpa [#allocation4], 1 }
  0xe4   :  { %538 = vsyncpa [#allocation10], 1 }

</bundles_post_ra>
